<compile_context>
chip_gen: v7x
topology: tpu7x:2x2x1
jax: 0.10.0
libtpu: 0.0.40
codegen_flags: <defaults>
</compile_context>

<pallas_src>
import math

import jax
import jax.numpy as jnp
from jax.experimental import pallas as pl
from jax.experimental.pallas import tpu as pltpu


def ff_kernel(x_ref, b_ref, a_ref, o_ref):
    # x_ref : (TN, 1)   tile of inputs
    # b_ref : (1, B)    frequencies 1..B (float32)
    # a_ref : (1, B)    pre-normalized amplitudes (1/b**p) / ||a||
    # o_ref : (TN, 2B)  output tile: [:, :B] sin features, [:, B:] cos features
    x = x_ref[...]                       # (TN, 1)
    b = b_ref[...]                       # (1, B)
    a = a_ref[...]                       # (1, B)

    xb = x * b                           # (TN, B) broadcast multiply (VPU)
    # Periodicity-based range reduction: sin/cos(2*pi*xb) == sin/cos(2*pi*(xb - round(xb)))
    t = xb - jnp.round(xb)               # in [-0.5, 0.5]
    phase = jnp.float32(2.0 * math.pi) * t

    s = a * jnp.sin(phase)               # (TN, B)
    c = a * jnp.cos(phase)               # (TN, B)

    # Assemble full row in vregs, then one lane-dense store.
    o_ref[...] = jnp.concatenate([s, c], axis=-1)


def _choose_tile_n(n_rows: int, band_limit: int) -> int:
    # Keep the double-buffered output tile (2 * tile_n * 2B * 4 bytes) <= ~16 MiB,
    # cap at 2048 rows, never exceed the (8-row padded) problem size.
    cap_from_vmem = max(8, ((1 << 20) // max(band_limit, 1)) // 8 * 8)
    tile = min(2048, cap_from_vmem)
    n_pad8 = ((n_rows + 7) // 8) * 8
    return max(8, min(tile, n_pad8))


def ff_forward(x, band_limit: int, p: float, *, tile_n: int | None = None):
    """x: (N, 1) float32 -> (N, 2*band_limit) float32."""
    N = x.shape[0]
    assert x.shape == (N, 1)
    x = x.astype(jnp.float32)

    if tile_n is None:
        tile_n = _choose_tile_n(N, band_limit)

    grid = pl.cdiv(N, tile_n)
    padded_n = grid * tile_n
    if padded_n != N:
        x = jnp.pad(x, ((0, padded_n - N), (0, 0)))

    # Hoisted constants: raw frequencies and pre-normalized amplitudes.
    b_s = jnp.arange(1, band_limit + 1, dtype=jnp.float32).reshape(1, band_limit)
    a_s = 1.0 / jnp.power(b_s, jnp.float32(p))
    a_norm = a_s / jnp.sqrt(jnp.sum(a_s * a_s))

    out_shape = jax.ShapeDtypeStruct((padded_n, 2 * band_limit), jnp.float32)

    # VMEM budget: double-buffered x tile (lane-padded to 128) + output tile,
    # plus the two tiny constant tiles; generous headroom, capped for v7x (64 MiB).
    est = 2 * (tile_n * 128 * 4 + tile_n * 2 * band_limit * 4) \
        + 4 * 8 * max(band_limit, 128) * 4
    vmem_limit = int(min(48 * 1024 * 1024, max(2 * est, 16 * 1024 * 1024)))

    out = pl.pallas_call(
        ff_kernel,
        out_shape=out_shape,
        grid_spec=pltpu.PrefetchScalarGridSpec(
            num_scalar_prefetch=0,
            grid=(grid,),
            in_specs=[
                pl.BlockSpec((tile_n, 1), lambda i: (i, 0)),
                pl.BlockSpec((1, band_limit), lambda i: (0, 0)),
                pl.BlockSpec((1, band_limit), lambda i: (0, 0)),
            ],
            out_specs=pl.BlockSpec((tile_n, 2 * band_limit), lambda i: (i, 0)),
        ),
        compiler_params=pltpu.CompilerParams(
            dimension_semantics=("parallel",),
            vmem_limit_bytes=vmem_limit,
        ),
    )(x, b_s, a_norm)

    if padded_n != N:
        out = out[:N]
    return out


def ff_reference(x, band_limit: int, p: float):
    b_s = jnp.arange(1, band_limit + 1, dtype=jnp.float32)
    a_s = 1.0 / jnp.power(b_s, jnp.float32(p))
    phase = 2.0 * math.pi * x * b_s
    out = jnp.concatenate([a_s * jnp.sin(phase), a_s * jnp.cos(phase)], axis=-1)
    return out / jnp.linalg.norm(a_s)


if __name__ == "__main__":
    band_limit = 64          # -> out_features = 128 (lane-dense output rows)
    p = 1.0
    N = 16                   # small batch of scalar inputs

    key = jax.random.PRNGKey(0)
    x = jax.random.uniform(key, (N, 1), dtype=jnp.float32)

    out = ff_forward(x, band_limit, p)
    out = jax.block_until_ready(out)

    ref = ff_reference(x, band_limit, p)
    assert out.shape == (N, 2 * band_limit)
    assert jnp.allclose(out, ref, atol=2e-5, rtol=1e-5), "mismatch vs reference"

    print("KERNEL_OK")
</pallas_src>

<mosaic_0001>
module attributes {stable_mosaic.version = 11 : i64} {
  func.func @ff_kernel(%arg0: i32, %arg1: memref<16x1xf32, #tpu.memory_space<vmem>>, %arg2: memref<1x64xf32, #tpu.memory_space<vmem>>, %arg3: memref<1x64xf32, #tpu.memory_space<vmem>>, %arg4: memref<16x128xf32, #tpu.memory_space<vmem>>) attributes {dimension_semantics = [#tpu.dimension_semantics<parallel>], iteration_bounds = array<i64: 1>, scalar_prefetch = 0 : i64, scratch_operands = 0 : i64, tpu.core_type = #tpu.core_type<tc>, window_params = [{transform_indices = @transform_0, window_bounds = array<i64: 16, 1>}, {pipeline_mode = #tpu.pipeline_mode<synchronous>, transform_indices = @transform_1, window_bounds = array<i64: 1, 64>}, {pipeline_mode = #tpu.pipeline_mode<synchronous>, transform_indices = @transform_2, window_bounds = array<i64: 1, 64>}, {transform_indices = @transform_3, window_bounds = array<i64: 16, 128>}]} {
    %c0 = arith.constant 0 : index
    %c0_0 = arith.constant 0 : index
    %0 = vector.load %arg1[%c0, %c0_0] : memref<16x1xf32, #tpu.memory_space<vmem>>, vector<16x1xf32>
    %c0_1 = arith.constant 0 : index
    %c0_2 = arith.constant 0 : index
    %1 = vector.load %arg2[%c0_1, %c0_2] : memref<1x64xf32, #tpu.memory_space<vmem>>, vector<1x64xf32>
    %c0_3 = arith.constant 0 : index
    %c0_4 = arith.constant 0 : index
    %2 = vector.load %arg3[%c0_3, %c0_4] : memref<1x64xf32, #tpu.memory_space<vmem>>, vector<1x64xf32>
    %3 = vector.broadcast %0 : vector<16x1xf32> to vector<16x64xf32>
    %4 = vector.broadcast %1 : vector<1x64xf32> to vector<16x64xf32>
    %5 = arith.mulf %3, %4 : vector<16x64xf32>
    %6 = math.roundeven %5 : vector<16x64xf32>
    %7 = arith.subf %5, %6 : vector<16x64xf32>
    %cst = arith.constant 6.28318548 : f32
    %8 = vector.broadcast %cst : f32 to vector<16x64xf32>
    %9 = arith.mulf %8, %7 : vector<16x64xf32>
    %10 = math.sin %9 : vector<16x64xf32>
    %11 = vector.broadcast %2 : vector<1x64xf32> to vector<16x64xf32>
    %12 = arith.mulf %11, %10 : vector<16x64xf32>
    %13 = math.cos %9 : vector<16x64xf32>
    %14 = vector.broadcast %2 : vector<1x64xf32> to vector<16x64xf32>
    %15 = arith.mulf %14, %13 : vector<16x64xf32>
    %16 = tpu.concatenate %12, %15 in 1 : vector<16x64xf32>, vector<16x64xf32> -> vector<16x128xf32>
    %c0_5 = arith.constant 0 : index
    %c0_6 = arith.constant 0 : index
    %17 = vector.load %arg4[%c0_5, %c0_6] : memref<16x128xf32, #tpu.memory_space<vmem>>, vector<16x128xf32>
    tpu.vector_store %arg4[%c0_5, %c0_6], %16 {strides = array<i32>} : memref<16x128xf32, #tpu.memory_space<vmem>>, vector<16x128xf32>,
    return
  }
  func.func @transform_0(%arg0: i32) -> (i32, i32) {
    %c0_i32 = arith.constant 0 : i32
    %c0_i32_0 = arith.constant 0 : i32
    return %arg0, %c0_i32 : i32, i32
  }
  func.func @transform_1(%arg0: i32) -> (i32, i32) {
    %c0_i32 = arith.constant 0 : i32
    %c0_i32_0 = arith.constant 0 : i32
    %c0_i32_1 = arith.constant 0 : i32
    return %c0_i32, %c0_i32_0 : i32, i32
  }
  func.func @transform_2(%arg0: i32) -> (i32, i32) {
    %c0_i32 = arith.constant 0 : i32
    %c0_i32_0 = arith.constant 0 : i32
    %c0_i32_1 = arith.constant 0 : i32
    return %c0_i32, %c0_i32_0 : i32, i32
  }
  func.func @transform_3(%arg0: i32) -> (i32, i32) {
    %c0_i32 = arith.constant 0 : i32
    %c0_i32_0 = arith.constant 0 : i32
    return %arg0, %c0_i32 : i32, i32
  }
}

</mosaic_0001>

<bundles_post_ra>
// kernel: tpu_custom_call.1
= control target key start
LH: loop header
LB: loop body
LE: loop exit
PB: predicated region body
PF: predicated region fallthrough
CT: control target
= control target key end

     0   :  { %v568_v1 = vmov 0   ;;  %s717_s0 = inlined_call_operand.vmem [shape: f32[16,1], index: 0, kind: input, shape index: {}]   ;;  %s718_s1 = inlined_call_operand.vmem [shape: f32[1,64], index: 1, kind: input, shape index: {}]   ;;  %s719_s2 = inlined_call_operand.vmem [shape: f32[1,64], index: 2, kind: input, shape index: {}]   ;;  %s720_s3 = inlined_call_operand.hbm [shape: f32[16,128], index: 3, kind: output, shape index: {}]  }
   0x1   :  { %v15_v0 = vld [vmem:[%s717_s0] sm:$0xff]  ;;  %535 = vset.pattern.permute.xlu0 %v568_v1 }
   0x2   :  { %21 = vperm.xlu0 %535, %v15_v0  }
   0x3   :  { %8 = vsyncpa [#allocation3], 0  ;;  %v16_v2 = vld [vmem:[%s717_s0 + $0x8] sm:$0xff]  ;;  %v496_v3 = vld [vmem:[%s718_s1] ss:$0 sm:$0xff]  ;;  %s576_s18 = smov [#allocation2]  }
   0x4   :  { %v569_v32 = vmov 2102212464   ;;  %v570_v34 = vmov 920167782   ;;  %v571_v38 = vmov 1326507024  }
   0x5   :  { %v572_v42 = vmov 683565275   ;;  %v573_v44 = vmov 2475754826   ;;  %v574_v46 = vmov 2131351028  }
   0x6   :  { %26 = vperm.xlu0 %535, %v16_v2   ;;  %s485_s19 = sshll.u32 %s576_s18, 4  ;;  %s486_s19 = int_to_ptr.vmem [resolvable:$true] %s485_s19 }
   0x7   :  { %s544_s20 = scalar_lea.vmem %s486_s19, 256  ;;  %p549_p1 = scmp.lt.s32.totalorder %s486_s19, %s486_s19 }
   0x8   :  { %p545_p0 = scmp.ne.s32.totalorder %s486_s19, %s544_s20  ;;  %p550_p2 = scmp.lt.s32.totalorder %s544_s20, %s544_s20 }
   0xa   :  { %p551_p3 = por %p550_p2, %p549_p1 }
   0xc   :  { %p552_p4 = pnand %p551_p3, %p545_p0 }
  0x81   :  { %v22_v4 = vpop.permute.xlu0 %21 }
  0x82   :  { %v35_v5 = vmul.f32 %v496_v3, %v22_v4 }
  0x84   :  { %v514_v6 = vround.rtne.f32 %v35_v5 }
  0x85   :  { %v27_v7 = vpop.permute.xlu0 %26 }
  0x86   :  { %v39_v8 = vsub.f32 %v35_v5, %v514_v6  ;;  %v36_v9 = vmul.f32 %v496_v3, %v27_v7 }
  0x88   :  { %v608_v10 = vmul.f32 6.2831855, %v39_v8  ;;  %v515_v11 = vround.rtne.f32 %v36_v9 }
  0x8a   :  { %v46_v12 = vand.u32 2139095040, %v608_v10  ;;  %v40_v13 = vsub.f32 %v36_v9, %v515_v11  ;;  %v43_v19 = vand.u32 2147483647, %v608_v10 }
  0x8c   :  { %v47_v14 = vshrl.u32 %v46_v12, 23  ;;  %v611_v15 = vmul.f32 6.2831855, %v40_v13  ;;  %v620_v24 = vand.u32 8388607, %v43_v19 }
  0x8e   :  { %v497_v16 = vadd.s32 4294967169, %v47_v14  ;;  %v147_v17 = vand.u32 2147483647, %v611_v15  ;;  %v150_v18 = vand.u32 2139095040, %v611_v15  ;;  %v51_v31 = vor.u32 8388608, %v620_v24 }
  0x8f   :  { %vm149_vm14 = vcmp.lt.s32.totalorder %v611_v15, 0 }
  0x90   :  { %v53_v20 = vadd.s32 1, %v497_v16  ;;  %v151_v21 = vshrl.u32 %v150_v18, 23  ;;  %v154_v22 = vand.u32 8388607, %v147_v17  ;;  %vm148_vm15 = vcmp.le.f32.partialorder %v147_v17, 0.7853982 }
  0x92   :  { %vm54_vm0 = vcmp.gt.s32.totalorder %v53_v20, 0  ;;  %v501_v23 = vadd.s32 4294967169, %v151_v21  ;;  %v155_v26 = vor.u32 8388608, %v154_v22 }
  0x93   :  { %v55_v25 = vsel %vm54_vm0, %v53_v20, 0  ;;  %vm45_vm0 = vcmp.lt.s32.totalorder %v608_v10, 0 }
  0x94   :  { %v622_v27 = vshrl.u32 %v55_v25, 5  ;;  %v57_v28 = vand.u32 31, %v55_v25  ;;  %v157_v29 = vadd.s32 1, %v501_v23  ;;  %v627_v36 = vshll.u32 %v155_v26, 8 }
  0x96   :  { %v624_v30 = vsub.s32 32, %v57_v28  ;;  %v69_v33 = vshll.u32 %v569_v32, %v57_v28  ;;  %v72_v35 = vshll.u32 %v570_v34, %v57_v28  ;;  %vm158_vm1 = vcmp.gt.s32.totalorder %v157_v29, 0 }
  0x97   :  { %vm78_vm2 = vcmp.lt.s32.totalorder %v622_v27, 4  ;;  %v159_v40 = vsel %vm158_vm1, %v157_v29, 0  ;;  %v60_v43 = vshll.u32 %v572_v42, %v57_v28  ;;  %v63_v45 = vshll.u32 %v573_v44, %v57_v28 }
  0x98   :  { %v70_v37 = vshrl.u32 %v570_v34, %v624_v30  ;;  %v73_v39 = vshrl.u32 %v571_v38, %v624_v30  ;;  %v161_v41 = vand.u32 31, %v159_v40  ;;  %v66_v47 = vshll.u32 %v574_v46, %v57_v28 }
  0x99   :  { %v160_v49 = vshrl.u32 %v159_v40, 5  ;;  %v61_v50 = vshrl.u32 %v573_v44, %v624_v30  ;;  %v64_v51 = vshrl.u32 %v574_v46, %v624_v30  ;;  %v67_v55 = vshrl.u32 %v569_v32, %v624_v30 }
  0x9a   :  { %v71_v48 = vor.u32 %v70_v37, %v69_v33  ;;  %v74_v52 = vor.u32 %v73_v39, %v72_v35  ;;  %v162_v53 = vsub.s32 32, %v161_v41  ;;  %v164_v54 = vshll.u32 %v572_v42, %v161_v41 }
  0x9b   :  { %v167_v57 = vshll.u32 %v573_v44, %v161_v41  ;;  %v170_v58 = vshll.u32 %v574_v46, %v161_v41  ;;  %v173_v59 = vshll.u32 %v569_v32, %v161_v41  ;;  %v176_v63 = vshll.u32 %v570_v34, %v161_v41 }
  0x9c   :  { %v84_v56 = vsel %vm78_vm2, %v71_v48, 920167782  ;;  %v165_v60 = vshrl.u32 %v573_v44, %v162_v53  ;;  %v168_v61 = vshrl.u32 %v574_v46, %v162_v53  ;;  %v171_v62 = vshrl.u32 %v569_v32, %v162_v53 }
  0x9d   :  { %vm75_vm3 = vcmp.lt.s32.totalorder %v622_v27, 1  ;;  %v163_v0 = vshrl.u32 %v572_v42, %v162_v53  ;;  %v174_v1 = vshrl.u32 %v570_v34, %v162_v53  ;;  %v177_v2 = vshrl.u32 %v571_v38, %v162_v53 }
  0x9e   :  { %vm179_vm4 = vcmp.lt.s32.totalorder %v160_v49, 1  ;;  %v166_v3 = vor.u32 %v165_v60, %v164_v54  ;;  %v169_v4 = vor.u32 %v168_v61, %v167_v57  ;;  %v172_v5 = vor.u32 %v171_v62, %v170_v58 }
  0x9f   :  { %vm181_vm5 = vcmp.lt.s32.totalorder %v160_v49, 3  ;;  %v175_v6 = vor.u32 %v174_v1, %v173_v59  ;;  %v178_v7 = vor.u32 %v177_v2, %v176_v63  ;;  %vm182_vm6 = vcmp.lt.s32.totalorder %v160_v49, 4 }
  0xa0   :  { %v62_v8 = vor.u32 %v61_v50, %v60_v43  ;;  %v183_v9 = vsel %vm179_vm4, %v163_v0, %v166_v3  ;;  %v184_v11 = vsel %vm182_vm6, %v172_v5, 2102212464  ;;  %v187_v12 = vsel %vm179_vm4, %v166_v3, %v169_v4 }
  0xa1   :  { %v191_v13 = vsel %vm179_vm4, %v169_v4, %v172_v5  ;;  %v185_v14 = vsel %vm181_vm5, %v169_v4, %v184_v11  ;;  %v188_v16 = vsel %vm182_vm6, %v175_v6, 920167782  ;;  %v192_v18 = vsel %vm182_vm6, %v178_v7, 1326507024 }
  0xa2   :  { %v65_v20 = vor.u32 %v64_v51, %v63_v45  ;;  %vm180_vm7 = vcmp.lt.s32.totalorder %v160_v49, 2  ;;  %v189_v21 = vsel %vm181_vm5, %v172_v5, %v188_v16  ;;  %v193_v22 = vsel %vm181_vm5, %v175_v6, %v192_v18 }
  0xa3   :  { %v68_v23 = vor.u32 %v67_v55, %v66_v47  ;;  %v88_v25 = vsel %vm78_vm2, %v74_v52, 1326507024  ;;  %v186_v26 = vsel %vm180_vm7, %v183_v9, %v185_v14  ;;  %v190_v28 = vsel %vm180_vm7, %v187_v12, %v189_v21 }
  0xa4   :  { %v194_v29 = vsel %vm180_vm7, %v191_v13, %v193_v22  ;;  %v645_v34 = vmul.u32.u64.low %v627_v36, %v190_v28  ;;  %v646_v35 = vmul.u32.u64.high %v627_v36, %v190_v28, %v645_v34  ;;  %v59_v37 = vshrl.u32 %v572_v42, %v624_v30 }
  0xa5   :  { %v641_v32 = vmul.u32.u64.low %v627_v36, %v194_v29  ;;  %v642_v33 = vmul.u32.u64.high %v627_v36, %v194_v29, %v641_v32  ;;  %vm77_vm8 = vcmp.lt.s32.totalorder %v622_v27, 3  ;;  %v80_v38 = vsel %vm78_vm2, %v68_v23, 2102212464 }
  0xa6   :  { %v83_v39 = vsel %vm75_vm3, %v62_v8, %v65_v20  ;;  %vm76_vm9 = vcmp.lt.s32.totalorder %v622_v27, 2  ;;  %v85_v40 = vsel %vm77_vm8, %v68_v23, %v84_v56  ;;  %v87_v41 = vsel %vm75_vm3, %v65_v20, %v68_v23 }
  0xa7   :  { %v89_v43 = vsel %vm77_vm8, %v71_v48, %v88_v25  ;;  %v202_v30 = vmul.u32 %v627_v36, %v186_v26  ;;  %v86_v42 = vsel %vm76_vm9, %v83_v39, %v85_v40  ;;  %v91_v45 = vshll.u32 %v51_v31, 8 }
  0xa8   :  { %v90_v44 = vsel %vm76_vm9, %v87_v41, %v89_v43  ;;  %vm204_vm10 = vc.u32 %v642_v33, %v645_v34  ;;  %v205_v46 = vadd.s32 1, %v646_v35  ;;  %v79_v47 = vsel %vm75_vm3, %v59_v37, %v62_v8 }
  0xa9   :  { %v81_v48 = vsel %vm77_vm8, %v65_v20, %v80_v38  ;;  %v674_v36 = vmul.u32.u64.low %v91_v45, %v90_v44  ;;  %v675_v49 = vmul.u32.u64.high %v91_v45, %v90_v44, %v674_v36  ;;  %v203_v8 = vadd.s32 %v645_v34, %v642_v33 }
  0xaa   :  { %v677_v50 = vmul.u32.u64.low %v91_v45, %v86_v42  ;;  %v678_v51 = vmul.u32.u64.high %v91_v45, %v86_v42, %v677_v50  ;;  %v206_v52 = vsel %vm204_vm10, %v205_v46, %v646_v35  ;;  %v82_v31 = vsel %vm76_vm9, %v79_v47, %v81_v48 }
  0xab   :  { %v207_v24 = vadd.s32 %v206_v52, %v202_v30  ;;  %v98_v55 = vmul.u32 %v91_v45, %v82_v31  ;;  %vm44_vm1 = vcmp.le.f32.partialorder %v43_v19, 0.7853982  ;;  %vm239_vm7 = vweird.f32 %v611_v15 }
  0xac   :  { %vm100_vm11 = vc.u32 %v675_v49, %v677_v50  ;;  %v101_v54 = vadd.s32 1, %v678_v51  ;;  %v99_v22 = vadd.s32 %v677_v50, %v675_v49 }
  0xad   :  { %v208_v53 = vadd.s32 536870912, %v207_v24 }
  0xae   :  { %v102_v57 = vsel %vm100_vm11, %v101_v54, %v678_v51 }
  0xaf   :  { %v209_v56 = vshrl.u32 %v208_v53, 30  ;;  %v103_v58 = vadd.s32 %v102_v57, %v98_v55 }
  0xb1   :  { %v210_v59 = vshll.u32 %v209_v56, 30  ;;  %v104_v60 = vadd.s32 536870912, %v103_v58  ;;  %v233_v39 = vsub.s32 4, %v209_v56 }
  0xb3   :  { %v211_v61 = vsub.s32 %v207_v24, %v210_v59  ;;  %v105_v62 = vshrl.u32 %v104_v60, 30  ;;  %v234_v44 = vsel %vm149_vm14, %v233_v39, %v209_v56 }
  0xb4   :  { %v236_v36 = vsel %vm148_vm15, 0, %v234_v44 }
  0xb5   :  { %v213_v63 = vsub.s32 0, %v211_v61  ;;  %v106_v0 = vshll.u32 %v105_v62, 30  ;;  %v129_v46 = vsub.s32 4, %v105_v62  ;;  %v240_v52 = vadd.s32 3, %v236_v36 }
  0xb6   :  { %v455_v54 = vand.u32 3, %v236_v36 }
  0xb7   :  { %v502_v1 = vmin.u32 %v213_v63, %v211_v61  ;;  %v107_v2 = vsub.s32 %v103_v58, %v106_v0  ;;  %v130_v50 = vsel %vm45_vm0, %v129_v46, %v105_v62  ;;  %v241_v24 = vand.u32 3, %v240_v52 }
  0xb8   :  { %v132_v17 = vsel %vm44_vm1, 0, %v130_v50  ;;  %vm457_vm5 = vcmp.eq.s32.totalorder %v455_v54, 0  ;;  %vm460_vm6 = vcmp.eq.s32.totalorder %v455_v54, 2  ;;  %vm456_vm9 = vcmp.lt.s32.totalorder %v455_v54, 2 }
  0xb9   :  { %v215_v27 = vclz %v502_v1  ;;  %v109_v3 = vsub.s32 0, %v107_v2  ;;  %v136_v31 = vadd.s32 3, %v132_v17  ;;  %v352_v57 = vand.u32 3, %v132_v17 }
  0xba   :  { %vm246_vm2 = vcmp.eq.s32.totalorder %v241_v24, 2  ;;  %vm243_vm3 = vcmp.eq.s32.totalorder %v241_v24, 0  ;;  %vm242_vm4 = vcmp.lt.s32.totalorder %v241_v24, 2 }
  0xbb   :  { %v503_v4 = vadd.s32 4294967294, %v215_v27  ;;  %v498_v5 = vmin.u32 %v109_v3, %v107_v2  ;;  %v137_v59 = vand.u32 3, %v136_v31  ;;  %vm354_vm8 = vcmp.eq.s32.totalorder %v352_v57, 0 }
  0xbc   :  { %vm357_vm11 = vcmp.eq.s32.totalorder %v352_v57, 2 }
  0xbd   :  { %vm504_vm12 = vcmp.lt.s32.totalorder %v503_v4, 0  ;;  %v111_v7 = vclz %v498_v5  ;;  %vm142_vm10 = vcmp.eq.s32.totalorder %v137_v59, 2 }
  0xbe   :  { %v218_v6 = vsel %vm504_vm12, 0, %v503_v4  ;;  %vm139_vm12 = vcmp.eq.s32.totalorder %v137_v59, 0 }
  0xbf   :  { %v219_v9 = vsub.s32 32, %v218_v6  ;;  %v223_v11 = vsub.s32 4294967266, %v218_v6  ;;  %v499_v12 = vadd.s32 4294967294, %v111_v7  ;;  %v220_v13 = vshll.u32 %v211_v61, %v218_v6 }
  0xc1   :  { %v221_v14 = vshrl.u32 %v203_v8, %v219_v9  ;;  %v224_v16 = vadd.s32 127, %v223_v11  ;;  %vm500_vm13 = vcmp.lt.s32.totalorder %v499_v12, 0 }
  0xc2   :  { %v114_v21 = vsel %vm500_vm13, 0, %v499_v12  ;;  %vm138_vm13 = vcmp.lt.s32.totalorder %v137_v59, 2 }
  0xc3   :  { %v222_v18 = vor.u32 %v221_v14, %v220_v13  ;;  %v225_v20 = vshll.u32 %v224_v16, 23  ;;  %v115_v23 = vsub.s32 32, %v114_v21  ;;  %v119_v25 = vsub.s32 4294967266, %v114_v21 }
  0xc4   :  { %v116_v28 = vshll.u32 %v107_v2, %v114_v21  ;;  %v505_v2 = vld [vmem:[%s719_s2] ss:$0 sm:$0xff]  ;;  %s575_s2 = smov 64  }
  0xc5   :  { %v226_v26 = vor.u32 4788187, %v225_v20  ;;  %v117_v29 = vshrl.u32 %v99_v22, %v115_v23  ;;  %v120_v32 = vadd.s32 127, %v119_v25  ;;  %v229_v33 = vcvt.s32.f32 %v222_v18 }
  0xc7   :  { %v227_v35 = vand.u32 2147483647, %v226_v26  ;;  %v118_v34 = vor.u32 %v117_v29, %v116_v28  ;;  %v121_v37 = vshll.u32 %v120_v32, 23 }
  0xc9   :  { %v230_v38 = vmul.f32 %v229_v33, %v227_v35  ;;  %v122_v40 = vor.u32 4788187, %v121_v37  ;;  %v125_v30 = vcvt.s32.f32 %v118_v34 }
  0xcb   :  { %v231_v41 = vxor.u32 2147483648, %v230_v38  ;;  %v123_v43 = vand.u32 2147483647, %v122_v40 }
  0xcd   :  { %v232_v42 = vsel %vm149_vm14, %v231_v41, %v230_v38  ;;  %v126_v45 = vmul.f32 %v125_v30, %v123_v43  ;;  %vm353_vm14 = vcmp.lt.s32.totalorder %v352_v57, 2 }
  0xce   :  { %v235_v47 = vsel %vm148_vm15, %v611_v15, %v232_v42  ;;  %vm135_vm15 = vweird.f32 %v608_v10 }
  0xcf   :  { %536 = vcosq.f32 %v235_v47  ;;  %v127_v48 = vxor.u32 2147483648, %v126_v45 }
  0xd0   :  { %538 = vsinq.f32 %v235_v47 }
  0xd1   :  { %v128_v49 = vsel %vm45_vm0, %v127_v48, %v126_v45  ;;  %vm475_vm0 = vcmask 523264  }
  0xd2   :  { %v131_v51 = vsel %vm44_vm1, %v608_v10, %v128_v49 }
  0xd3   :  { %540 = vcosq.f32 %v131_v51 }
  0xd4   :  { %542 = vsinq.f32 %v131_v51 }
  0xd9   :  { %v537_v53 = vpop.eup %536 }
  0xda   :  { %v539_v55 = vpop.eup %538  ;;  %v247_v56 = vxor.u32 2147483648, %v537_v53 }
  0xdb   :  { %v244_v58 = vxor.u32 2147483648, %v539_v55 }
  0xdc   :  { %v248_v19 = vsel %vm246_vm2, %v247_v56, %v539_v55  ;;  %v462_v63 = vsel %vm460_vm6, %v247_v56, %v539_v55 }
  0xdd   :  { %v245_v60 = vsel %vm243_vm3, %v537_v53, %v244_v58  ;;  %v541_v61 = vpop.eup %540  ;;  %v459_v62 = vsel %vm457_vm5, %v537_v53, %v244_v58 }
  0xde   :  { %v249_v0 = vsel %vm242_vm4, %v245_v60, %v248_v19  ;;  %v543_v1 = vpop.eup %542  ;;  %v143_v27 = vxor.u32 2147483648, %v541_v61  ;;  %v463_v8 = vsel %vm456_vm9, %v459_v62, %v462_v63 }
  0xdf   :  { %v250_v3 = vsel %vm239_vm7, nan, %v249_v0  ;;  %v140_v4 = vxor.u32 2147483648, %v543_v1  ;;  %v464_v18 = vsel %vm239_vm7, nan, %v463_v8 }
  0xe0   :  { %v258_v5 = vmul.f32 %v505_v2, %v250_v3  ;;  %v359_v6 = vsel %vm357_vm11, %v143_v27, %v543_v1  ;;  %v144_v7 = vsel %vm142_vm10, %v143_v27, %v543_v1  ;;  %v466_v22 = vmul.f32 %v505_v2, %v464_v18 }
  0xe1   :  { %v356_v9 = vsel %vm354_vm8, %v541_v61, %v140_v4  ;;  %v141_v11 = vsel %vm139_vm12, %v541_v61, %v140_v4 }
  0xe2   :  { %v360_v12 = vsel %vm353_vm14, %v356_v9, %v359_v6  ;;  %v145_v13 = vsel %vm138_vm13, %v141_v11, %v144_v7 }
  0xe3   :  { %v361_v14 = vsel %vm135_vm15, nan, %v360_v12  ;;  %v146_v16 = vsel %vm135_vm15, nan, %v145_v13 }
  0xe4   :  { %v465_v20 = vmul.f32 %v505_v2, %v361_v14  ;;  %v257_v21 = vmul.f32 %v505_v2, %v146_v16 }
  0xe6   :  { %469 = vrot.lane.b32.xlu1 %v465_v20, %s575_s2 }
  0xea   :  { %471 = vrot.lane.b32.xlu1 %v466_v22, %s575_s2 }
 0x158   :  { %v470_v23 = vpop.permute.xlu1 %469 }
 0x159   :  { %v476_v25 = vsel %vm475_vm0, %v257_v21, %v470_v23 }
 0x15a   :  { %478 = vst [vmem:[#allocation2] sm:$0xff] %v476_v25 }
 0x15c   :  { %v472_v10 = vpop.permute.xlu1 %471 }
 0x15d   :  { %v477_v26 = vsel %vm475_vm0, %v258_v5, %v472_v10 }
 0x15e   :  { %479 = vst [vmem:[#allocation2 + $0x8] sm:$0xff] %v477_v26 }
 0x15f   :  { %555 = shalt.err (!%p552_p4)
}
 0x160   :  { %s556_s23 = scalar_lea.hbm %s720_s3, 256 }
 0x161   :  { %p557_p5 = scmp.ne.s32.totalorder %s720_s3, %s556_s23  ;;  %p560_p6 = scmp.lt.u32.totalorder %s556_s23, %s720_s3 }
 0x163   :  { %p562_p7 = pnand %p560_p6, %p557_p5 }
 0x165   :  { %565 = shalt.err (!%p562_p7)
}
 0x166   :  { %s577_s28 = smov 128   ;;  %s578_s29 = smov 8  }
 0x167   :  { %491 = dma.vmem_to_hbm [thread:$0]  %s486_s19, 256, %s720_s3, [#allocation3], %s577_s28, %s577_s28, %s578_s29  }
 0x168   :  { %566 = dma.done.wait [#allocation3], 256  }
 0x169   :  { %567 = vsyncadd [#allocation3], 4294967040 }
 0x16a   :  { %495 = vsyncpa [#allocation3], 1 }

</bundles_post_ra>
